<compile_context>
chip_gen: v5e
topology: v5e:2x2
jax: 0.10.0
libtpu: 0.0.40
codegen_flags: <defaults>
</compile_context>

<pallas_src>
import functools

import jax
import jax.numpy as jnp
from jax.experimental import pallas as pl
from jax.experimental.pallas import tpu as pltpu


def _round_up(n, m):
    return (n + m - 1) // m * m


def _mlp_kernel(x_ref, w1_ref, b1_ref, w2_ref, b2_ref, w3_ref, b3_ref, o_ref,
                *, matmul_dtype):
    """Fused 3-layer MLP: Linear -> ReLU -> Linear -> ReLU -> Linear.

    Matmuls run on the MXU with f32 accumulation; operand casts to `matmul_dtype`
    happen in-kernel (VPU, hidden under MXU work). Bias adds / ReLU stay f32.
    """
    x = x_ref[...].astype(matmul_dtype)
    h1 = jnp.dot(x, w1_ref[...], preferred_element_type=jnp.float32) + b1_ref[...]
    h1 = jnp.maximum(h1, 0.0)
    h2 = jnp.dot(h1.astype(matmul_dtype), w2_ref[...],
                 preferred_element_type=jnp.float32) + b2_ref[...]
    h2 = jnp.maximum(h2, 0.0)
    out = jnp.dot(h2.astype(matmul_dtype), w3_ref[...],
                  preferred_element_type=jnp.float32) + b3_ref[...]
    o_ref[...] = out.astype(o_ref.dtype)


def prepare_params(params, matmul_dtype=jnp.bfloat16):
    """One-time parameter preparation (do NOT call per forward step).

    Casts weights to the MXU operand dtype and biases to f32, and pads the last
    layer's output features up to a multiple of 128 so output stores are
    lane-dense (unmasked vst). Returns (prepared_params, out_features).
    """
    w1, b1, w2, b2, w3, b3 = params
    d_out = w3.shape[1]
    d_out_pad = _round_up(d_out, 128)
    if d_out_pad != d_out:
        pad = d_out_pad - d_out
        w3 = jnp.pad(w3, ((0, 0), (0, pad)))
        b3 = jnp.pad(b3, ((0, 0), (0, pad)))
    prepared = (
        w1.astype(matmul_dtype), b1.astype(jnp.float32),
        w2.astype(matmul_dtype), b2.astype(jnp.float32),
        w3.astype(matmul_dtype), b3.astype(jnp.float32),
    )
    return prepared, d_out


@functools.partial(
    jax.jit,
    static_argnames=("tile_m", "matmul_dtype", "out_dtype", "out_features"))
def input_generator_forward(x, prepared_params, *, tile_m=1024,
                            matmul_dtype=jnp.bfloat16, out_dtype=None,
                            out_features=None):
    """Pallas TPU forward for InputGenerator (in -> 256 -> 512 -> 2*out_dim)."""
    w1, b1, w2, b2, w3, b3 = prepared_params
    B, D_in = x.shape
    H1, H2, D_out = w1.shape[1], w2.shape[1], w3.shape[1]
    out_dtype = x.dtype if out_dtype is None else out_dtype

    # Batch tile: whole batch for small B; otherwise at least 2 grid steps so the
    # "parallel" batch axis can shard across both v7x TensorCores, tile rounded to a
    # multiple of 8 (sublane rule), capped at tile_m.
    if B <= 64:
        tm = B
    else:
        tm = min(_round_up(tile_m, 8), _round_up(pl.cdiv(B, 2), 8))
    grid = (pl.cdiv(B, tm),)

    # Large tiles exceed v5e's 16 MiB scoped-VMEM default; still well inside every
    # generation's physical VMEM (including v7x's 64 MiB).
    vmem_limit = 32 * 1024 * 1024 if tm > 512 else None

    nbytes = lambda a: a.size * a.dtype.itemsize
    cost = pl.CostEstimate(
        flops=2 * B * (D_in * H1 + H1 * H2 + H2 * D_out),
        transcendentals=0,
        bytes_accessed=(nbytes(x) + nbytes(w1) + nbytes(w2) + nbytes(w3)
                        + nbytes(b1) + nbytes(b2) + nbytes(b3)
                        + B * D_out * jnp.dtype(out_dtype).itemsize),
    )

    wspec = lambda shape: pl.BlockSpec(shape, lambda i: (0, 0))  # grid-invariant
    out = pl.pallas_call(
        functools.partial(_mlp_kernel, matmul_dtype=matmul_dtype),
        out_shape=jax.ShapeDtypeStruct((B, D_out), out_dtype),
        grid_spec=pltpu.PrefetchScalarGridSpec(
            num_scalar_prefetch=0,
            grid=grid,
            in_specs=[
                pl.BlockSpec((tm, D_in), lambda i: (i, 0)),  # x tile over batch
                wspec((D_in, H1)),                           # W1
                wspec((1, H1)),                              # b1
                wspec((H1, H2)),                             # W2
                wspec((1, H2)),                              # b2
                wspec((H2, D_out)),                          # W3
                wspec((1, D_out)),                           # b3
            ],
            out_specs=pl.BlockSpec((tm, D_out), lambda i: (i, 0)),
        ),
        compiler_params=pltpu.CompilerParams(
            dimension_semantics=("parallel",),   # batch axis -> both TCs on v7x
            vmem_limit_bytes=vmem_limit,
        ),
        cost_estimate=cost,
    )(x, w1, b1, w2, b2, w3, b3)

    if out_features is not None and out_features != D_out:
        out = out[:, :out_features]   # strip lane padding added by prepare_params
    return out


def init_params(key, input_dim, output_dim, dtype=jnp.float32):
    """Deterministic init matching nn.Linear shapes (weights stored as (in, out))."""
    dims = [(input_dim, 256), (256, 512), (512, output_dim * 2)]
    params = []
    for fan_in, fan_out in dims:
        key, kw, kb = jax.random.split(key, 3)
        bound = 1.0 / (fan_in ** 0.5)
        w = jax.random.uniform(kw, (fan_in, fan_out), dtype, -bound, bound)
        b = jax.random.uniform(kb, (1, fan_out), dtype, -bound, bound)
        params.extend([w, b])
    return tuple(params)


def reference_forward(x, params):
    w1, b1, w2, b2, w3, b3 = params
    h1 = jnp.maximum(x @ w1 + b1, 0.0)
    h2 = jnp.maximum(h1 @ w2 + b2, 0.0)
    return h2 @ w3 + b3


if __name__ == "__main__":
    key = jax.random.PRNGKey(0)
    k_param, k_x = jax.random.split(key)

    batch = 8
    input_dim = 32     # latent / noise dim
    output_dim = 64    # module outputs output_dim * 2 = 128 features

    params = init_params(k_param, input_dim, output_dim)
    x = jax.random.normal(k_x, (batch, input_dim), dtype=jnp.float32)
    ref = reference_forward(x, params)

    # Exactness check: f32 matmul path must match the XLA reference tightly.
    prepared_f32, feat = prepare_params(params, matmul_dtype=jnp.float32)
    out_f32 = jax.block_until_ready(
        input_generator_forward(x, prepared_f32, matmul_dtype=jnp.float32,
                                out_features=feat))
    assert out_f32.shape == (batch, output_dim * 2), out_f32.shape
    assert jnp.allclose(out_f32, ref, atol=1e-4, rtol=1e-4), "f32 path mismatch"

    # Default (performance) path: bf16 MXU operands (cast in-kernel), f32 accumulation.
    prepared_bf16, feat = prepare_params(params)   # one-time weight cast / padding
    out = jax.block_until_ready(
        input_generator_forward(x, prepared_bf16, out_features=feat))
    assert out.shape == (batch, output_dim * 2), out.shape
    assert jnp.allclose(out, ref, atol=5e-2, rtol=5e-2), "bf16 path mismatch"

    print("KERNEL_OK")
</pallas_src>

<mosaic_0001>
module attributes {stable_mosaic.version = 11 : i64} {
  func.func @_mlp_kernel(%arg0: i32, %arg1: memref<8x32xf32, #tpu.memory_space<vmem>>, %arg2: memref<32x256xf32, #tpu.memory_space<vmem>>, %arg3: memref<1x256xf32, #tpu.memory_space<vmem>>, %arg4: memref<256x512xf32, #tpu.memory_space<vmem>>, %arg5: memref<1x512xf32, #tpu.memory_space<vmem>>, %arg6: memref<512x128xf32, #tpu.memory_space<vmem>>, %arg7: memref<1x128xf32, #tpu.memory_space<vmem>>, %arg8: memref<8x128xf32, #tpu.memory_space<vmem>>) attributes {dimension_semantics = [#tpu.dimension_semantics<parallel>], iteration_bounds = array<i64: 1>, scalar_prefetch = 0 : i64, scratch_operands = 0 : i64, tpu.core_type = #tpu.core_type<tc>, window_params = [{transform_indices = @transform_0, window_bounds = array<i64: 8, 32>}, {pipeline_mode = #tpu.pipeline_mode<synchronous>, transform_indices = @transform_1, window_bounds = array<i64: 32, 256>}, {pipeline_mode = #tpu.pipeline_mode<synchronous>, transform_indices = @transform_2, window_bounds = array<i64: 1, 256>}, {pipeline_mode = #tpu.pipeline_mode<synchronous>, transform_indices = @transform_3, window_bounds = array<i64: 256, 512>}, {pipeline_mode = #tpu.pipeline_mode<synchronous>, transform_indices = @transform_4, window_bounds = array<i64: 1, 512>}, {pipeline_mode = #tpu.pipeline_mode<synchronous>, transform_indices = @transform_5, window_bounds = array<i64: 512, 128>}, {pipeline_mode = #tpu.pipeline_mode<synchronous>, transform_indices = @transform_6, window_bounds = array<i64: 1, 128>}, {transform_indices = @transform_7, window_bounds = array<i64: 8, 128>}]} {
    %c0 = arith.constant 0 : index
    %c0_0 = arith.constant 0 : index
    %0 = vector.load %arg1[%c0, %c0_0] : memref<8x32xf32, #tpu.memory_space<vmem>>, vector<8x32xf32>
    %c0_1 = arith.constant 0 : index
    %c0_2 = arith.constant 0 : index
    %1 = vector.load %arg2[%c0_1, %c0_2] : memref<32x256xf32, #tpu.memory_space<vmem>>, vector<32x256xf32>
    %cst = arith.constant dense<0.000000e+00> : vector<8x256xf32>
    %2 = tpu.matmul %0, %1, %cst {dimension_numbers = #tpu.dot_dimension_numbers<[1], [0], [0], [1], [0, 0, 1, 1], [], []>} : vector<8x32xf32>, vector<32x256xf32>, vector<8x256xf32> -> vector<8x256xf32>
    %c0_3 = arith.constant 0 : index
    %c0_4 = arith.constant 0 : index
    %3 = vector.load %arg3[%c0_3, %c0_4] : memref<1x256xf32, #tpu.memory_space<vmem>>, vector<1x256xf32>
    %4 = vector.broadcast %3 : vector<1x256xf32> to vector<8x256xf32>
    %5 = arith.addf %2, %4 : vector<8x256xf32>
    %cst_5 = arith.constant 0.000000e+00 : f32
    %6 = vector.broadcast %cst_5 : f32 to vector<8x256xf32>
    %7 = arith.maximumf %5, %6 : vector<8x256xf32>
    %c0_6 = arith.constant 0 : index
    %c0_7 = arith.constant 0 : index
    %8 = vector.load %arg4[%c0_6, %c0_7] : memref<256x512xf32, #tpu.memory_space<vmem>>, vector<256x512xf32>
    %cst_8 = arith.constant dense<0.000000e+00> : vector<8x512xf32>
    %9 = tpu.matmul %7, %8, %cst_8 {dimension_numbers = #tpu.dot_dimension_numbers<[1], [0], [0], [1], [0, 0, 1, 1], [], []>} : vector<8x256xf32>, vector<256x512xf32>, vector<8x512xf32> -> vector<8x512xf32>
    %c0_9 = arith.constant 0 : index
    %c0_10 = arith.constant 0 : index
    %10 = vector.load %arg5[%c0_9, %c0_10] : memref<1x512xf32, #tpu.memory_space<vmem>>, vector<1x512xf32>
    %11 = vector.broadcast %10 : vector<1x512xf32> to vector<8x512xf32>
    %12 = arith.addf %9, %11 : vector<8x512xf32>
    %cst_11 = arith.constant 0.000000e+00 : f32
    %13 = vector.broadcast %cst_11 : f32 to vector<8x512xf32>
    %14 = arith.maximumf %12, %13 : vector<8x512xf32>
    %c0_12 = arith.constant 0 : index
    %c0_13 = arith.constant 0 : index
    %15 = vector.load %arg6[%c0_12, %c0_13] : memref<512x128xf32, #tpu.memory_space<vmem>>, vector<512x128xf32>
    %cst_14 = arith.constant dense<0.000000e+00> : vector<8x128xf32>
    %16 = tpu.matmul %14, %15, %cst_14 {dimension_numbers = #tpu.dot_dimension_numbers<[1], [0], [0], [1], [0, 0, 1, 1], [], []>} : vector<8x512xf32>, vector<512x128xf32>, vector<8x128xf32> -> vector<8x128xf32>
    %c0_15 = arith.constant 0 : index
    %c0_16 = arith.constant 0 : index
    %17 = vector.load %arg7[%c0_15, %c0_16] : memref<1x128xf32, #tpu.memory_space<vmem>>, vector<1x128xf32>
    %18 = vector.broadcast %17 : vector<1x128xf32> to vector<8x128xf32>
    %19 = arith.addf %16, %18 : vector<8x128xf32>
    %c0_17 = arith.constant 0 : index
    %c0_18 = arith.constant 0 : index
    %20 = vector.load %arg8[%c0_17, %c0_18] : memref<8x128xf32, #tpu.memory_space<vmem>>, vector<8x128xf32>
    tpu.vector_store %arg8[%c0_17, %c0_18], %19 {strides = array<i32>} : memref<8x128xf32, #tpu.memory_space<vmem>>, vector<8x128xf32>,
    return
  }
  func.func @transform_0(%arg0: i32) -> (i32, i32) {
    %c0_i32 = arith.constant 0 : i32
    %c0_i32_0 = arith.constant 0 : i32
    return %arg0, %c0_i32 : i32, i32
  }
  func.func @transform_1(%arg0: i32) -> (i32, i32) {
    %c0_i32 = arith.constant 0 : i32
    %c0_i32_0 = arith.constant 0 : i32
    %c0_i32_1 = arith.constant 0 : i32
    return %c0_i32, %c0_i32_0 : i32, i32
  }
  func.func @transform_2(%arg0: i32) -> (i32, i32) {
    %c0_i32 = arith.constant 0 : i32
    %c0_i32_0 = arith.constant 0 : i32
    %c0_i32_1 = arith.constant 0 : i32
    return %c0_i32, %c0_i32_0 : i32, i32
  }
  func.func @transform_3(%arg0: i32) -> (i32, i32) {
    %c0_i32 = arith.constant 0 : i32
    %c0_i32_0 = arith.constant 0 : i32
    %c0_i32_1 = arith.constant 0 : i32
    return %c0_i32, %c0_i32_0 : i32, i32
  }
  func.func @transform_4(%arg0: i32) -> (i32, i32) {
    %c0_i32 = arith.constant 0 : i32
    %c0_i32_0 = arith.constant 0 : i32
    %c0_i32_1 = arith.constant 0 : i32
    return %c0_i32, %c0_i32_0 : i32, i32
  }
  func.func @transform_5(%arg0: i32) -> (i32, i32) {
    %c0_i32 = arith.constant 0 : i32
    %c0_i32_0 = arith.constant 0 : i32
    %c0_i32_1 = arith.constant 0 : i32
    return %c0_i32, %c0_i32_0 : i32, i32
  }
  func.func @transform_6(%arg0: i32) -> (i32, i32) {
    %c0_i32 = arith.constant 0 : i32
    %c0_i32_0 = arith.constant 0 : i32
    %c0_i32_1 = arith.constant 0 : i32
    return %c0_i32, %c0_i32_0 : i32, i32
  }
  func.func @transform_7(%arg0: i32) -> (i32, i32) {
    %c0_i32 = arith.constant 0 : i32
    %c0_i32_0 = arith.constant 0 : i32
    return %arg0, %c0_i32 : i32, i32
  }
}

</mosaic_0001>

<bundles_post_ra>
// kernel: input_generator_forward.1
= control target key start
LH: loop header
LB: loop body
LE: loop exit
PB: predicated region body
PF: predicated region fallthrough
CT: control target
= control target key end

     0   :  { %12 = vsyncpa [#allocation3], 0  ;;  %s918_s0 = inlined_call_operand.hbm [shape: f32[8,32], index: 0, kind: input, shape index: {}]   ;;  %s919_s1 = inlined_call_operand.hbm [shape: f32[32,256], index: 1, kind: input, shape index: {}]   ;;  %s920_s2 = inlined_call_operand.hbm [shape: f32[1,256], index: 2, kind: input, shape index: {}]   ;;  %s921_s3 = inlined_call_operand.hbm [shape: f32[256,512], index: 3, kind: input, shape index: {}]   ;;  %s922_s4 = inlined_call_operand.hbm [shape: f32[1,512], index: 4, kind: input, shape index: {}]   ;;  %s923_s5 = inlined_call_operand.hbm [shape: f32[512,128], index: 5, kind: input, shape index: {}]   ;;  %s924_s6 = inlined_call_operand.vmem [shape: f32[1,128], index: 6, kind: input, shape index: {}]   ;;  %s925_s7 = inlined_call_operand.hbm [shape: f32[8,128], index: 7, kind: output, shape index: {}]  }
   0x1   :  { %13 = vsyncpa [#allocation6], 0 }
   0x2   :  { %14 = vsyncpa [#allocation9], 0 }
   0x3   :  { %15 = vsyncpa [#allocation12], 0  ;;  %s32_s26 = sshll.u32 %s919_s1, 4  ;;  %s33_s26 = int_to_ptr.hbm [resolvable:$true] %s32_s26 }
   0x4   :  { %16 = vsyncpa [#allocation4], 0  ;;  %s841_s27 = smov [#allocation5]   ;;  %s56_s8 = sshll.u32 %s921_s3, 4  ;;  %s57_s8 = int_to_ptr.hbm [resolvable:$true] %s56_s8 }
   0x5   :  { %s34_s28 = sshll.u32 %s841_s27, 4  ;;  %s842_s9 = smov 256   ;;  %s35_s28 = int_to_ptr.vmem [resolvable:$true] %s34_s28 }
   0x6   :  { %s843_s10 = smov 16   ;;  %s844_s11 = smov [#allocation8]  }
   0x7   :  { %40 = dma.hbm_to_vmem [thread:$0]  %s33_s26, 1024, %s35_s28, [#allocation6], %s842_s9, %s842_s9, %s843_s10  }
   0x8   :  { %s58_s12 = sshll.u32 %s844_s11, 4  ;;  %s845_s13 = smov 512   ;;  %s59_s12 = int_to_ptr.vmem [resolvable:$true] %s58_s12 }
   0x9   :  { %s846_s14 = smov 32   ;;  %s22_s16 = sshll.u32 %s918_s0, 4  ;;  %s23_s16 = int_to_ptr.hbm [resolvable:$true] %s22_s16 }
   0xa   :  { %64 = dma.hbm_to_vmem [thread:$0]  %s57_s8, 16384, %s59_s12, [#allocation9], %s845_s13, %s845_s13, %s846_s14  }
   0xb   :  { %s847_s17 = smov [#allocation2]   ;;  %s46_s20 = sshll.u32 %s920_s2, 4  ;;  %s47_s20 = int_to_ptr.hbm [resolvable:$true] %s46_s20 }
   0xc   :  { %s24_s18 = sshll.u32 %s847_s17, 4  ;;  %s848_s21 = smov [#allocation7]   ;;  %s25_s18 = int_to_ptr.vmem [resolvable:$true] %s24_s18 }
   0xd   :  { %27 = dma.hbm_to_vmem [thread:$0]  %s23_s16, 128, %s25_s18, [#allocation3]  }
   0xe   :  { %s48_s22 = sshll.u32 %s848_s21, 4  ;;  %s70_s25 = sshll.u32 %s922_s4, 4  ;;  %s49_s22 = int_to_ptr.vmem [resolvable:$true] %s48_s22  ;;  %s71_s25 = int_to_ptr.hbm [resolvable:$true] %s70_s25 }
   0xf   :  { %51 = dma.hbm_to_vmem [thread:$0]  %s47_s20, 32, %s49_s22, [#allocation6]  }
  0x10   :  { %s80_s27 = sshll.u32 %s923_s5, 4  ;;  %s849_s28 = smov [#allocation10]   ;;  %s81_s27 = int_to_ptr.hbm [resolvable:$true] %s80_s27 }
  0x11   :  { %s72_s29 = sshll.u32 %s849_s28, 4  ;;  %s850_s2 = smov [#allocation11]   ;;  %s73_s29 = int_to_ptr.vmem [resolvable:$true] %s72_s29 }
  0x12   :  { %75 = dma.hbm_to_vmem [thread:$0]  %s71_s25, 64, %s73_s29, [#allocation9]  }
  0x13   :  { %s82_s30 = sshll.u32 %s850_s2, 4  ;;  %s851_s8 = smov 128   ;;  %s83_s30 = int_to_ptr.vmem [resolvable:$true] %s82_s30 }
  0x14   :  { %s852_s9 = smov 8  }
  0x15   :  { %88 = dma.hbm_to_vmem [thread:$0]  %s81_s27, 8192, %s83_s30, [#allocation12], %s851_s8, %s851_s8, %s852_s9  }
  0x16   :  { %831 = dma.done.wait [#allocation3], 128  }
  0x17   :  { %832 = vsyncadd [#allocation3], 4294967168 }
  0x18   :  { %833 = dma.done.wait [#allocation6], 1056  }
  0x19   :  { %834 = vsyncadd [#allocation6], 4294966240 }
  0x1a   :  { %835 = dma.done.wait [#allocation9], 16448  }
  0x1b   :  { %836 = vsyncadd [#allocation9], 4294950848 }
  0x1c   :  { %837 = dma.done.wait [#allocation12], 8192  }
  0x1d   :  { %838 = vsyncadd [#allocation12], 4294959104  ;;  %v122_v0 = vld [vmem:[#allocation5 + $0x30] sm:$0xff]  ;;  %v123_v1 = vld [vmem:[#allocation5 + $0x38] sm:$0xff]  ;;  %vm130_vm0 = vcmask 261120   ;;  %s853_s10 = smov [#allocation13]  }
  0x1e   :  { %v120_v2 = vld [vmem:[#allocation5 + $0x20] sm:$0xff]  ;;  %146 = vmatpush.msra.mxu0 %v122_v0  ;;  %166 = vmatpush.msra.mxu1 %v123_v1  ;;  %v121_v3 = vld [vmem:[#allocation5 + $0x28] sm:$0xff]  ;;  %v118_v4 = vld [vmem:[#allocation5 + $0x10] sm:$0xff]  ;;  %s632_s11 = sshll.u32 %s853_s10, 4  ;;  %s634_s14 = sshll.u32 %s925_s7, 4  ;;  %s633_s11 = int_to_ptr.vmem [resolvable:$true] %s632_s11  ;;  %s635_s14 = int_to_ptr.hbm [resolvable:$true] %s634_s14 }
  0x1f   :  { %v119_v5 = vld [vmem:[#allocation5 + $0x18] sm:$0xff]  ;;  %v116_v6 = vld [vmem:[#allocation5] sm:$0xff]  ;;  %v117_v9 = vld [vmem:[#allocation5 + $0x8] sm:$0xff] }
  0x20   :  { %147 = vmatpush.msra.mxu0 %v120_v2  ;;  %167 = vmatpush.msra.mxu1 %v121_v3  ;;  %v236_v7 = vld [vmem:[#allocation8 + $0x1e0] sm:$0xff]  ;;  %v115_v12 = vld [vmem:[#allocation2] sm:$0xff]  ;;  %v237_v13 = vld [vmem:[#allocation8 + $0x1e8] sm:$0xff] }
  0x21   :  { %v300_v8 = vld [vmem:[#allocation8 + $0x3e0] sm:$0xff]  ;;  %314 = vmatpush.msra.mxu2 %v236_v7  ;;  %v301_v14 = vld [vmem:[#allocation8 + $0x3e8] sm:$0xff]  ;;  %v238_v7 = vld [vmem:[#allocation8 + $0x1f0] sm:$0xff] }
  0x22   :  { %334 = vmatpush.msra.mxu3 %v300_v8  ;;  %v232_v10 = vld [vmem:[#allocation8 + $0x1c0] sm:$0xff]  ;;  %148 = vmatpush.msra.mxu0 %v118_v4  ;;  %v233_v17 = vld [vmem:[#allocation8 + $0x1c8] sm:$0xff]  ;;  %v302_v8 = vld [vmem:[#allocation8 + $0x3f0] sm:$0xff] }
  0x23   :  { %v296_v11 = vld [vmem:[#allocation8 + $0x3c0] sm:$0xff]  ;;  %168 = vmatpush.msra.mxu1 %v119_v5  ;;  %315 = vmatpush.msra.mxu2 %v232_v10  ;;  %v297_v18 = vld [vmem:[#allocation8 + $0x3c8] sm:$0xff] }
  0x24   :  { %335 = vmatpush.msra.mxu3 %v296_v11  ;;  %149 = vmatpush.msra.mxu0 %v116_v6  ;;  %v228_v15 = vld [vmem:[#allocation8 + $0x1a0] sm:$0xff]  ;;  %v229_v21 = vld [vmem:[#allocation8 + $0x1a8] sm:$0xff]  ;;  %v239_v11 = vld [vmem:[#allocation8 + $0x1f8] sm:$0xff] }
  0x25   :  { %169 = vmatpush.msra.mxu1 %v117_v9  ;;  %v292_v16 = vld [vmem:[#allocation8 + $0x3a0] sm:$0xff]  ;;  %647 = vmatmul.msk.f32.vlgmr.msra.gmra.mxu0 %vm130_vm0, %v115_v12  ;;  %v293_v22 = vld [vmem:[#allocation8 + $0x3a8] sm:$0xff] }
  0x26   :  { %648 = vmatmul.msk.f32.vlgmr.msra.gmra.mxu1 %vm130_vm0, %v115_v12  ;;  %354 = vmatpush.msrb.mxu0 %v237_v13  ;;  %v224_v19 = vld [vmem:[#allocation8 + $0x180] sm:$0xff]  ;;  %v225_v25 = vld [vmem:[#allocation8 + $0x188] sm:$0xff]  ;;  %v303_v12 = vld [vmem:[#allocation8 + $0x3f8] sm:$0xff] }
  0x27   :  { %374 = vmatpush.msrb.mxu1 %v301_v14  ;;  %v288_v20 = vld [vmem:[#allocation8 + $0x380] sm:$0xff]  ;;  %316 = vmatpush.msra.mxu2 %v228_v15  ;;  %v289_v26 = vld [vmem:[#allocation8 + $0x388] sm:$0xff]  ;;  %v234_v13 = vld [vmem:[#allocation8 + $0x1d0] sm:$0xff] }
  0x28   :  { %336 = vmatpush.msra.mxu3 %v292_v16  ;;  %355 = vmatpush.msrb.mxu0 %v233_v17  ;;  %v220_v23 = vld [vmem:[#allocation8 + $0x160] sm:$0xff]  ;;  %v221_v29 = vld [vmem:[#allocation8 + $0x168] sm:$0xff]  ;;  %v298_v14 = vld [vmem:[#allocation8 + $0x3d0] sm:$0xff] }
  0x29   :  { %375 = vmatpush.msrb.mxu1 %v297_v18  ;;  %v284_v24 = vld [vmem:[#allocation8 + $0x360] sm:$0xff]  ;;  %317 = vmatpush.msra.mxu2 %v224_v19  ;;  %v285_v30 = vld [vmem:[#allocation8 + $0x368] sm:$0xff]  ;;  %v235_v15 = vld [vmem:[#allocation8 + $0x1d8] sm:$0xff] }
  0x2a   :  { %337 = vmatpush.msra.mxu3 %v288_v20  ;;  %356 = vmatpush.msrb.mxu0 %v229_v21  ;;  %v216_v27 = vld [vmem:[#allocation8 + $0x140] sm:$0xff]  ;;  %v217_v33 = vld [vmem:[#allocation8 + $0x148] sm:$0xff]  ;;  %v299_v16 = vld [vmem:[#allocation8 + $0x3d8] sm:$0xff] }
  0x2b   :  { %376 = vmatpush.msrb.mxu1 %v293_v22  ;;  %v280_v28 = vld [vmem:[#allocation8 + $0x340] sm:$0xff]  ;;  %318 = vmatpush.msra.mxu2 %v220_v23  ;;  %v281_v34 = vld [vmem:[#allocation8 + $0x348] sm:$0xff]  ;;  %v230_v17 = vld [vmem:[#allocation8 + $0x1b0] sm:$0xff] }
  0x2c   :  { %338 = vmatpush.msra.mxu3 %v284_v24  ;;  %357 = vmatpush.msrb.mxu0 %v225_v25  ;;  %v212_v31 = vld [vmem:[#allocation8 + $0x120] sm:$0xff]  ;;  %v213_v37 = vld [vmem:[#allocation8 + $0x128] sm:$0xff]  ;;  %v294_v18 = vld [vmem:[#allocation8 + $0x3b0] sm:$0xff] }
  0x2d   :  { %377 = vmatpush.msrb.mxu1 %v289_v26  ;;  %v276_v32 = vld [vmem:[#allocation8 + $0x320] sm:$0xff]  ;;  %319 = vmatpush.msra.mxu2 %v216_v27  ;;  %v277_v38 = vld [vmem:[#allocation8 + $0x328] sm:$0xff]  ;;  %v231_v19 = vld [vmem:[#allocation8 + $0x1b8] sm:$0xff] }
  0x2e   :  { %339 = vmatpush.msra.mxu3 %v280_v28  ;;  %358 = vmatpush.msrb.mxu0 %v221_v29  ;;  %v208_v35 = vld [vmem:[#allocation8 + $0x100] sm:$0xff]  ;;  %v209_v41 = vld [vmem:[#allocation8 + $0x108] sm:$0xff]  ;;  %v295_v20 = vld [vmem:[#allocation8 + $0x3b8] sm:$0xff] }
  0x2f   :  { %378 = vmatpush.msrb.mxu1 %v285_v30  ;;  %v272_v36 = vld [vmem:[#allocation8 + $0x300] sm:$0xff]  ;;  %320 = vmatpush.msra.mxu2 %v212_v31  ;;  %v273_v42 = vld [vmem:[#allocation8 + $0x308] sm:$0xff]  ;;  %v226_v21 = vld [vmem:[#allocation8 + $0x190] sm:$0xff] }
  0x30   :  { %340 = vmatpush.msra.mxu3 %v276_v32  ;;  %359 = vmatpush.msrb.mxu0 %v217_v33  ;;  %v204_v39 = vld [vmem:[#allocation8 + $0xe0] sm:$0xff]  ;;  %v205_v45 = vld [vmem:[#allocation8 + $0xe8] sm:$0xff]  ;;  %v290_v22 = vld [vmem:[#allocation8 + $0x390] sm:$0xff] }
  0x31   :  { %379 = vmatpush.msrb.mxu1 %v281_v34  ;;  %v268_v40 = vld [vmem:[#allocation8 + $0x2e0] sm:$0xff]  ;;  %321 = vmatpush.msra.mxu2 %v208_v35  ;;  %v269_v46 = vld [vmem:[#allocation8 + $0x2e8] sm:$0xff]  ;;  %v227_v23 = vld [vmem:[#allocation8 + $0x198] sm:$0xff] }
  0x32   :  { %341 = vmatpush.msra.mxu3 %v272_v36  ;;  %360 = vmatpush.msrb.mxu0 %v213_v37  ;;  %v200_v43 = vld [vmem:[#allocation8 + $0xc0] sm:$0xff]  ;;  %v201_v49 = vld [vmem:[#allocation8 + $0xc8] sm:$0xff]  ;;  %v291_v24 = vld [vmem:[#allocation8 + $0x398] sm:$0xff] }
  0x33   :  { %380 = vmatpush.msrb.mxu1 %v277_v38  ;;  %v264_v44 = vld [vmem:[#allocation8 + $0x2c0] sm:$0xff]  ;;  %322 = vmatpush.msra.mxu2 %v204_v39  ;;  %v265_v50 = vld [vmem:[#allocation8 + $0x2c8] sm:$0xff]  ;;  %v222_v25 = vld [vmem:[#allocation8 + $0x170] sm:$0xff] }
  0x34   :  { %342 = vmatpush.msra.mxu3 %v268_v40  ;;  %361 = vmatpush.msrb.mxu0 %v209_v41  ;;  %v196_v47 = vld [vmem:[#allocation8 + $0xa0] sm:$0xff]  ;;  %v197_v53 = vld [vmem:[#allocation8 + $0xa8] sm:$0xff]  ;;  %v286_v26 = vld [vmem:[#allocation8 + $0x370] sm:$0xff] }
  0x35   :  { %381 = vmatpush.msrb.mxu1 %v273_v42  ;;  %v260_v48 = vld [vmem:[#allocation8 + $0x2a0] sm:$0xff]  ;;  %323 = vmatpush.msra.mxu2 %v200_v43  ;;  %v261_v54 = vld [vmem:[#allocation8 + $0x2a8] sm:$0xff]  ;;  %v223_v27 = vld [vmem:[#allocation8 + $0x178] sm:$0xff] }
  0x36   :  { %343 = vmatpush.msra.mxu3 %v264_v44  ;;  %362 = vmatpush.msrb.mxu0 %v205_v45  ;;  %v192_v51 = vld [vmem:[#allocation8 + $0x80] sm:$0xff]  ;;  %v193_v57 = vld [vmem:[#allocation8 + $0x88] sm:$0xff]  ;;  %v287_v28 = vld [vmem:[#allocation8 + $0x378] sm:$0xff] }
  0x37   :  { %382 = vmatpush.msrb.mxu1 %v269_v46  ;;  %v256_v52 = vld [vmem:[#allocation8 + $0x280] sm:$0xff]  ;;  %324 = vmatpush.msra.mxu2 %v196_v47  ;;  %v257_v58 = vld [vmem:[#allocation8 + $0x288] sm:$0xff]  ;;  %v218_v29 = vld [vmem:[#allocation8 + $0x150] sm:$0xff] }
  0x38   :  { %344 = vmatpush.msra.mxu3 %v260_v48  ;;  %363 = vmatpush.msrb.mxu0 %v201_v49  ;;  %v188_v55 = vld [vmem:[#allocation8 + $0x60] sm:$0xff]  ;;  %v189_v61 = vld [vmem:[#allocation8 + $0x68] sm:$0xff]  ;;  %v282_v30 = vld [vmem:[#allocation8 + $0x350] sm:$0xff] }
  0x39   :  { %383 = vmatpush.msrb.mxu1 %v265_v50  ;;  %v252_v56 = vld [vmem:[#allocation8 + $0x260] sm:$0xff]  ;;  %325 = vmatpush.msra.mxu2 %v192_v51  ;;  %v253_v62 = vld [vmem:[#allocation8 + $0x268] sm:$0xff]  ;;  %v219_v31 = vld [vmem:[#allocation8 + $0x158] sm:$0xff] }
  0x3a   :  { %345 = vmatpush.msra.mxu3 %v256_v52  ;;  %364 = vmatpush.msrb.mxu0 %v197_v53  ;;  %v184_v59 = vld [vmem:[#allocation8 + $0x40] sm:$0xff]  ;;  %v185_v1 = vld [vmem:[#allocation8 + $0x48] sm:$0xff]  ;;  %v283_v32 = vld [vmem:[#allocation8 + $0x358] sm:$0xff] }
  0x3b   :  { %384 = vmatpush.msrb.mxu1 %v261_v54  ;;  %v248_v60 = vld [vmem:[#allocation8 + $0x240] sm:$0xff]  ;;  %326 = vmatpush.msra.mxu2 %v188_v55  ;;  %v249_v2 = vld [vmem:[#allocation8 + $0x248] sm:$0xff]  ;;  %v214_v33 = vld [vmem:[#allocation8 + $0x130] sm:$0xff] }
  0x3c   :  { %346 = vmatpush.msra.mxu3 %v252_v56  ;;  %365 = vmatpush.msrb.mxu0 %v193_v57  ;;  %v180_v63 = vld [vmem:[#allocation8 + $0x20] sm:$0xff]  ;;  %v181_v5 = vld [vmem:[#allocation8 + $0x28] sm:$0xff]  ;;  %v278_v34 = vld [vmem:[#allocation8 + $0x330] sm:$0xff] }
  0x3d   :  { %385 = vmatpush.msrb.mxu1 %v257_v58  ;;  %v244_v0 = vld [vmem:[#allocation8 + $0x220] sm:$0xff]  ;;  %327 = vmatpush.msra.mxu2 %v184_v59  ;;  %v245_v6 = vld [vmem:[#allocation8 + $0x228] sm:$0xff]  ;;  %v215_v35 = vld [vmem:[#allocation8 + $0x138] sm:$0xff] }
  0x3e   :  { %347 = vmatpush.msra.mxu3 %v248_v60  ;;  %366 = vmatpush.msrb.mxu0 %v189_v61  ;;  %v176_v3 = vld [vmem:[#allocation8] sm:$0xff]  ;;  %v177_v9 = vld [vmem:[#allocation8 + $0x8] sm:$0xff]  ;;  %v279_v36 = vld [vmem:[#allocation8 + $0x338] sm:$0xff] }
  0x3f   :  { %386 = vmatpush.msrb.mxu1 %v253_v62  ;;  %v240_v4 = vld [vmem:[#allocation8 + $0x200] sm:$0xff]  ;;  %328 = vmatpush.msra.mxu2 %v180_v63  ;;  %v241_v10 = vld [vmem:[#allocation8 + $0x208] sm:$0xff]  ;;  %v210_v37 = vld [vmem:[#allocation8 + $0x110] sm:$0xff] }
  0x40   :  { %348 = vmatpush.msra.mxu3 %v244_v0  ;;  %367 = vmatpush.msrb.mxu0 %v185_v1  ;;  %v274_v38 = vld [vmem:[#allocation8 + $0x310] sm:$0xff]  ;;  %v211_v39 = vld [vmem:[#allocation8 + $0x118] sm:$0xff] }
  0x41   :  { %387 = vmatpush.msrb.mxu1 %v249_v2  ;;  %329 = vmatpush.msra.mxu2 %v176_v3  ;;  %v275_v40 = vld [vmem:[#allocation8 + $0x318] sm:$0xff]  ;;  %v206_v41 = vld [vmem:[#allocation8 + $0xf0] sm:$0xff] }
  0x42   :  { %349 = vmatpush.msra.mxu3 %v240_v4  ;;  %368 = vmatpush.msrb.mxu0 %v181_v5  ;;  %v270_v42 = vld [vmem:[#allocation8 + $0x2f0] sm:$0xff]  ;;  %v207_v43 = vld [vmem:[#allocation8 + $0xf8] sm:$0xff] }
  0x43   :  { %388 = vmatpush.msrb.mxu1 %v245_v6  ;;  %394 = vmatpush.msrb.mxu2 %v238_v7  ;;  %v271_v44 = vld [vmem:[#allocation8 + $0x2f8] sm:$0xff]  ;;  %v202_v45 = vld [vmem:[#allocation8 + $0xd0] sm:$0xff] }
  0x44   :  { %414 = vmatpush.msrb.mxu3 %v302_v8  ;;  %369 = vmatpush.msrb.mxu0 %v177_v9  ;;  %v266_v46 = vld [vmem:[#allocation8 + $0x2d0] sm:$0xff]  ;;  %v203_v47 = vld [vmem:[#allocation8 + $0xd8] sm:$0xff] }
  0x45   :  { %389 = vmatpush.msrb.mxu1 %v241_v10  ;;  %395 = vmatpush.msrb.mxu2 %v234_v13  ;;  %v267_v48 = vld [vmem:[#allocation8 + $0x2d8] sm:$0xff]  ;;  %v198_v49 = vld [vmem:[#allocation8 + $0xb0] sm:$0xff] }
  0x46   :  { %434 = vmatpush.msra.mxu0 %v239_v11  ;;  %415 = vmatpush.msrb.mxu3 %v298_v14  ;;  %v262_v50 = vld [vmem:[#allocation8 + $0x2b0] sm:$0xff]  ;;  %v199_v51 = vld [vmem:[#allocation8 + $0xb8] sm:$0xff] }
  0x47   :  { %454 = vmatpush.msra.mxu1 %v303_v12  ;;  %396 = vmatpush.msrb.mxu2 %v230_v17  ;;  %v263_v52 = vld [vmem:[#allocation8 + $0x2b8] sm:$0xff]  ;;  %v194_v53 = vld [vmem:[#allocation8 + $0x90] sm:$0xff] }
  0x48   :  { %435 = vmatpush.msra.mxu0 %v235_v15  ;;  %416 = vmatpush.msrb.mxu3 %v294_v18  ;;  %v258_v54 = vld [vmem:[#allocation8 + $0x290] sm:$0xff]  ;;  %v195_v55 = vld [vmem:[#allocation8 + $0x98] sm:$0xff] }
  0x49   :  { %455 = vmatpush.msra.mxu1 %v299_v16  ;;  %397 = vmatpush.msrb.mxu2 %v226_v21  ;;  %v259_v56 = vld [vmem:[#allocation8 + $0x298] sm:$0xff]  ;;  %v190_v57 = vld [vmem:[#allocation8 + $0x70] sm:$0xff] }
  0x4a   :  { %436 = vmatpush.msra.mxu0 %v231_v19  ;;  %417 = vmatpush.msrb.mxu3 %v290_v22  ;;  %v254_v58 = vld [vmem:[#allocation8 + $0x270] sm:$0xff]  ;;  %v191_v59 = vld [vmem:[#allocation8 + $0x78] sm:$0xff] }
  0x4b   :  { %456 = vmatpush.msra.mxu1 %v295_v20  ;;  %398 = vmatpush.msrb.mxu2 %v222_v25  ;;  %v255_v60 = vld [vmem:[#allocation8 + $0x278] sm:$0xff]  ;;  %v186_v61 = vld [vmem:[#allocation8 + $0x50] sm:$0xff] }
  0x4c   :  { %437 = vmatpush.msra.mxu0 %v227_v23  ;;  %418 = vmatpush.msrb.mxu3 %v286_v26  ;;  %v250_v62 = vld [vmem:[#allocation8 + $0x250] sm:$0xff]  ;;  %v187_v63 = vld [vmem:[#allocation8 + $0x58] sm:$0xff] }
  0x4d   :  { %457 = vmatpush.msra.mxu1 %v291_v24  ;;  %399 = vmatpush.msrb.mxu2 %v218_v29  ;;  %v251_v0 = vld [vmem:[#allocation8 + $0x258] sm:$0xff]  ;;  %v182_v1 = vld [vmem:[#allocation8 + $0x30] sm:$0xff] }
  0x4e   :  { %438 = vmatpush.msra.mxu0 %v223_v27  ;;  %419 = vmatpush.msrb.mxu3 %v282_v30  ;;  %v246_v2 = vld [vmem:[#allocation8 + $0x230] sm:$0xff]  ;;  %v183_v3 = vld [vmem:[#allocation8 + $0x38] sm:$0xff]  ;;  %v506_v30 = vld [vmem:[#allocation11 + $0xe0] sm:$0xff] }
  0x4f   :  { %458 = vmatpush.msra.mxu1 %v287_v28  ;;  %400 = vmatpush.msrb.mxu2 %v214_v33  ;;  %v247_v4 = vld [vmem:[#allocation8 + $0x238] sm:$0xff]  ;;  %v178_v5 = vld [vmem:[#allocation8 + $0x10] sm:$0xff]  ;;  %v522_v33 = vld [vmem:[#allocation11 + $0x160] sm:$0xff] }
  0x50   :  { %439 = vmatpush.msra.mxu0 %v219_v31  ;;  %420 = vmatpush.msrb.mxu3 %v278_v34  ;;  %v242_v6 = vld [vmem:[#allocation8 + $0x210] sm:$0xff]  ;;  %v179_v7 = vld [vmem:[#allocation8 + $0x18] sm:$0xff]  ;;  %v490_v31 = vld [vmem:[#allocation11 + $0x60] sm:$0xff] }
  0x51   :  { %459 = vmatpush.msra.mxu1 %v283_v32  ;;  %401 = vmatpush.msrb.mxu2 %v210_v37  ;;  %v243_v8 = vld [vmem:[#allocation8 + $0x218] sm:$0xff]  ;;  %v507_v26 = vld [vmem:[#allocation11 + $0xe8] sm:$0xff]  ;;  %v538_v32 = vld [vmem:[#allocation11 + $0x1e0] sm:$0xff] }
  0x52   :  { %440 = vmatpush.msra.mxu0 %v215_v35  ;;  %421 = vmatpush.msrb.mxu3 %v274_v38  ;;  %v124_v9 = vld [vmem:[#allocation7] sm:$0x3]  ;;  %v508_v22 = vld [vmem:[#allocation11 + $0xf0] sm:$0xff]  ;;  %v491_v27 = vld [vmem:[#allocation11 + $0x68] sm:$0xff] }
  0x53   :  { %460 = vmatpush.msra.mxu1 %v279_v36  ;;  %402 = vmatpush.msrb.mxu2 %v206_v41  ;;  %v126_v10 = vperm.slane %v124_v9, 0  ;;  %v127_v11 = vperm.slane %v124_v9, 1  ;;  %v509_v18 = vld [vmem:[#allocation11 + $0xf8] sm:$0xff]  ;;  %v492_v23 = vld [vmem:[#allocation11 + $0x70] sm:$0xff]  ;;  %v539_v28 = vld [vmem:[#allocation11 + $0x1e8] sm:$0xff] }
  0x54   :  { %441 = vmatpush.msra.mxu0 %v211_v39  ;;  %422 = vmatpush.msrb.mxu3 %v270_v42  ;;  %v493_v19 = vld [vmem:[#allocation11 + $0x78] sm:$0xff]  ;;  %v540_v24 = vld [vmem:[#allocation11 + $0x1f0] sm:$0xff]  ;;  %v523_v29 = vld [vmem:[#allocation11 + $0x168] sm:$0xff] }
  0x55   :  { %461 = vmatpush.msra.mxu1 %v275_v40  ;;  %403 = vmatpush.msrb.mxu2 %v202_v45  ;;  %v541_v20 = vld [vmem:[#allocation11 + $0x1f8] sm:$0xff]  ;;  %v524_v25 = vld [vmem:[#allocation11 + $0x170] sm:$0xff]  ;;  %v503_v41 = vld [vmem:[#allocation11 + $0xc8] sm:$0xff] }
  0x56   :  { %442 = vmatpush.msra.mxu0 %v207_v43  ;;  %423 = vmatpush.msrb.mxu3 %v266_v46  ;;  %v525_v21 = vld [vmem:[#allocation11 + $0x178] sm:$0xff]  ;;  %v504_v38 = vld [vmem:[#allocation11 + $0xd0] sm:$0xff]  ;;  %v487_v42 = vld [vmem:[#allocation11 + $0x48] sm:$0xff] }
  0x57   :  { %462 = vmatpush.msra.mxu1 %v271_v44  ;;  %404 = vmatpush.msrb.mxu2 %v198_v49  ;;  %v505_v34 = vld [vmem:[#allocation11 + $0xd8] sm:$0xff]  ;;  %v488_v39 = vld [vmem:[#allocation11 + $0x50] sm:$0xff]  ;;  %v535_v43 = vld [vmem:[#allocation11 + $0x1c8] sm:$0xff] }
  0x58   :  { %443 = vmatpush.msra.mxu0 %v203_v47  ;;  %424 = vmatpush.msrb.mxu3 %v262_v50  ;;  %v489_v35 = vld [vmem:[#allocation11 + $0x58] sm:$0xff]  ;;  %v536_v40 = vld [vmem:[#allocation11 + $0x1d0] sm:$0xff]  ;;  %v502_v44 = vld [vmem:[#allocation11 + $0xc0] sm:$0xff] }
  0x59   :  { %463 = vmatpush.msra.mxu1 %v267_v48  ;;  %405 = vmatpush.msrb.mxu2 %v194_v53  ;;  %v537_v36 = vld [vmem:[#allocation11 + $0x1d8] sm:$0xff]  ;;  %v486_v45 = vld [vmem:[#allocation11 + $0x40] sm:$0xff]  ;;  %v500_v49 = vld [vmem:[#allocation11 + $0xb0] sm:$0xff] }
  0x5a   :  { %444 = vmatpush.msra.mxu0 %v199_v51  ;;  %425 = vmatpush.msrb.mxu3 %v258_v54  ;;  %v521_v37 = vld [vmem:[#allocation11 + $0x158] sm:$0xff]  ;;  %v534_v46 = vld [vmem:[#allocation11 + $0x1c0] sm:$0xff]  ;;  %v499_v50 = vld [vmem:[#allocation11 + $0xa8] sm:$0xff] }
  0x5b   :  { %464 = vmatpush.msra.mxu1 %v263_v52  ;;  %406 = vmatpush.msrb.mxu2 %v190_v57  ;;  %v501_v47 = vld [vmem:[#allocation11 + $0xb8] sm:$0xff]  ;;  %v498_v51 = vld [vmem:[#allocation11 + $0xa0] sm:$0xff]  ;;  %v484_v52 = vld [vmem:[#allocation11 + $0x30] sm:$0xff] }
  0x5c   :  { %445 = vmatpush.msra.mxu0 %v195_v55  ;;  %426 = vmatpush.msrb.mxu3 %v254_v58  ;;  %v485_v48 = vld [vmem:[#allocation11 + $0x38] sm:$0xff]  ;;  %v520_v54 = vld [vmem:[#allocation11 + $0x150] sm:$0xff]  ;;  %v519_v58 = vld [vmem:[#allocation11 + $0x148] sm:$0xff] }
  0x5d   :  { %465 = vmatpush.msra.mxu1 %v259_v56  ;;  %407 = vmatpush.msrb.mxu2 %v186_v61  ;;  %v497_v53 = vld [vmem:[#allocation11 + $0x98] sm:$0xff]  ;;  %v483_v56 = vld [vmem:[#allocation11 + $0x28] sm:$0xff]  ;;  %v496_v57 = vld [vmem:[#allocation11 + $0x90] sm:$0xff] }
  0x5e   :  { %446 = vmatpush.msra.mxu0 %v191_v59  ;;  %427 = vmatpush.msrb.mxu3 %v250_v62  ;;  %v533_v55 = vld [vmem:[#allocation11 + $0x1b8] sm:$0xff]  ;;  %v532_v59 = vld [vmem:[#allocation11 + $0x1b0] sm:$0xff]  ;;  %v495_v61 = vld [vmem:[#allocation11 + $0x88] sm:$0xff] }
  0x5f   :  { %466 = vmatpush.msra.mxu1 %v255_v60  ;;  %408 = vmatpush.msrb.mxu2 %v182_v1  ;;  %v482_v60 = vld [vmem:[#allocation11 + $0x20] sm:$0xff]  ;;  %v528_v9 = vld [vmem:[#allocation11 + $0x190] sm:$0xff] }
  0x60   :  { %447 = vmatpush.msra.mxu0 %v187_v63  ;;  %428 = vmatpush.msrb.mxu3 %v246_v2  ;;  %v518_v62 = vld [vmem:[#allocation11 + $0x140] sm:$0xff]  ;;  %v531_v63 = vld [vmem:[#allocation11 + $0x1a8] sm:$0xff]  ;;  %v517_v2 = vld [vmem:[#allocation11 + $0x138] sm:$0xff] }
  0x61   :  { %467 = vmatpush.msra.mxu1 %v251_v0  ;;  %409 = vmatpush.msrb.mxu2 %v178_v5  ;;  %v481_v0 = vld [vmem:[#allocation11 + $0x18] sm:$0xff]  ;;  %v494_v1 = vld [vmem:[#allocation11 + $0x80] sm:$0xff]  ;;  %v516_v5 = vld [vmem:[#allocation11 + $0x130] sm:$0xff] }
  0x62   :  { %448 = vmatpush.msra.mxu0 %v183_v3  ;;  %429 = vmatpush.msrb.mxu3 %v242_v6  ;;  %v530_v3 = vld [vmem:[#allocation11 + $0x1a0] sm:$0xff]  ;;  %v529_v6 = vld [vmem:[#allocation11 + $0x198] sm:$0xff] }
  0x63   :  { %468 = vmatpush.msra.mxu1 %v247_v4  ;;  %v480_v4 = vld [vmem:[#allocation11 + $0x10] sm:$0xff] }
  0x64   :  { %449 = vmatpush.msra.mxu0 %v179_v7  ;;  %v479_v7 = vld [vmem:[#allocation11 + $0x8] sm:$0xff] }
  0x65   :  { %469 = vmatpush.msra.mxu1 %v243_v8  ;;  %v515_v8 = vld [vmem:[#allocation11 + $0x128] sm:$0xff] }
  0xa2   :  { %v151_v12 = vpop.f32.mrf.mxu0 }
  0xa3   :  { %v171_v13 = vpop.f32.mrf.mxu1  ;;  %v152_v14 = vadd.f32 %v151_v12, %v126_v10  ;;  %v478_v10 = vld [vmem:[#allocation11] sm:$0xff]  ;;  %v527_v12 = vld [vmem:[#allocation11 + $0x188] sm:$0xff] }
  0xa4   :  { %v172_v15 = vadd.f32 %v171_v13, %v127_v11  ;;  %v514_v11 = vld [vmem:[#allocation11 + $0x120] sm:$0xff]  ;;  %v513_v13 = vld [vmem:[#allocation11 + $0x118] sm:$0xff] }
  0xa5   :  { %v174_v16 = vmax.f32 %v152_v14, 0.0  ;;  %v526_v14 = vld [vmem:[#allocation11 + $0x180] sm:$0xff] }
  0xa6   :  { %v175_v17 = vmax.f32 %v172_v15, 0.0  ;;  %v512_v15 = vld [vmem:[#allocation11 + $0x110] sm:$0xff] }
  0xa7   :  { %330 = vmatmul.f32.vlgmr.msra.gmra.mxu2 %v174_v16  ;;  %370 = vmatmul.f32.vlgmr.msrb.gmra.mxu0 %v174_v16 }
  0xa8   :  { %350 = vmatmul.f32.vlgmr.msra.gmra.mxu3 %v175_v17  ;;  %390 = vmatmul.f32.vlgmr.msrb.gmra.mxu1 %v175_v17 }
  0xa9   :  { %566 = vmatpush.msra.mxu3 %v509_v18  ;;  %546 = vmatpush.msra.mxu2 %v493_v19  ;;  %v304_v18 = vld [vmem:[#allocation10] sm:$0xf] }
  0xaa   :  { %606 = vmatpush.msrb.mxu1 %v541_v20  ;;  %586 = vmatpush.msrb.mxu0 %v525_v21  ;;  %v307_v19 = vperm.slane %v304_v18, 1 }
  0xab   :  { %567 = vmatpush.msra.mxu3 %v508_v22  ;;  %547 = vmatpush.msra.mxu2 %v492_v23  ;;  %v306_v23 = vperm.slane %v304_v18, 0 }
  0xac   :  { %607 = vmatpush.msrb.mxu1 %v540_v24  ;;  %587 = vmatpush.msrb.mxu0 %v524_v25 }
  0xad   :  { %568 = vmatpush.msra.mxu3 %v507_v26  ;;  %548 = vmatpush.msra.mxu2 %v491_v27 }
  0xae   :  { %608 = vmatpush.msrb.mxu1 %v539_v28  ;;  %588 = vmatpush.msrb.mxu0 %v523_v29  ;;  %v309_v28 = vperm.slane %v304_v18, 3 }
  0xaf   :  { %410 = vmatmul.f32.vlgmr.msrb.gmra.mxu2 %v174_v16  ;;  %450 = vmatmul.f32.vlgmr.msra.gmra.mxu0 %v174_v16  ;;  %v511_v16 = vld [vmem:[#allocation11 + $0x108] sm:$0xff] }
  0xb0   :  { %430 = vmatmul.f32.vlgmr.msrb.gmra.mxu3 %v175_v17  ;;  %470 = vmatmul.f32.vlgmr.msra.gmra.mxu1 %v175_v17  ;;  %v510_v17 = vld [vmem:[#allocation11 + $0x100] sm:$0xff] }
  0xb1   :  { %569 = vmatpush.msra.mxu3 %v506_v30  ;;  %549 = vmatpush.msra.mxu2 %v490_v31 }
  0xb2   :  { %609 = vmatpush.msrb.mxu1 %v538_v32  ;;  %589 = vmatpush.msrb.mxu0 %v522_v33 }
  0xb3   :  { %570 = vmatpush.msra.mxu3 %v505_v34  ;;  %550 = vmatpush.msra.mxu2 %v489_v35  ;;  %v308_v35 = vperm.slane %v304_v18, 2 }
  0xb4   :  { %610 = vmatpush.msrb.mxu1 %v537_v36  ;;  %590 = vmatpush.msrb.mxu0 %v521_v37 }
  0xb5   :  { %571 = vmatpush.msra.mxu3 %v504_v38  ;;  %551 = vmatpush.msra.mxu2 %v488_v39 }
  0xb6   :  { %611 = vmatpush.msrb.mxu1 %v536_v40  ;;  %591 = vmatpush.msrb.mxu0 %v520_v54 }
  0xb7   :  { %572 = vmatpush.msra.mxu3 %v503_v41  ;;  %552 = vmatpush.msra.mxu2 %v487_v42 }
  0xb8   :  { %612 = vmatpush.msrb.mxu1 %v535_v43  ;;  %592 = vmatpush.msrb.mxu0 %v519_v58  ;;  %v662_v43 = vld [vmem:[%s924_s6] ss:$0 sm:$0xff] }
  0xb9   :  { %573 = vmatpush.msra.mxu3 %v502_v44  ;;  %553 = vmatpush.msra.mxu2 %v486_v45 }
  0xba   :  { %613 = vmatpush.msrb.mxu1 %v534_v46  ;;  %593 = vmatpush.msrb.mxu0 %v518_v62 }
  0xbb   :  { %574 = vmatpush.msra.mxu3 %v501_v47  ;;  %554 = vmatpush.msra.mxu2 %v485_v48 }
  0xbc   :  { %614 = vmatpush.msrb.mxu1 %v533_v55  ;;  %594 = vmatpush.msrb.mxu0 %v517_v2 }
  0xbd   :  { %575 = vmatpush.msra.mxu3 %v500_v49  ;;  %555 = vmatpush.msra.mxu2 %v484_v52 }
  0xbe   :  { %615 = vmatpush.msrb.mxu1 %v532_v59  ;;  %595 = vmatpush.msrb.mxu0 %v516_v5 }
  0xbf   :  { %576 = vmatpush.msra.mxu3 %v499_v50  ;;  %556 = vmatpush.msra.mxu2 %v483_v56 }
  0xc0   :  { %616 = vmatpush.msrb.mxu1 %v531_v63  ;;  %596 = vmatpush.msrb.mxu0 %v515_v8 }
  0xc1   :  { %577 = vmatpush.msra.mxu3 %v498_v51  ;;  %557 = vmatpush.msra.mxu2 %v482_v60 }
  0xc2   :  { %617 = vmatpush.msrb.mxu1 %v530_v3  ;;  %597 = vmatpush.msrb.mxu0 %v514_v11 }
  0xc3   :  { %578 = vmatpush.msra.mxu3 %v497_v53  ;;  %558 = vmatpush.msra.mxu2 %v481_v0 }
  0xc4   :  { %618 = vmatpush.msrb.mxu1 %v529_v6  ;;  %598 = vmatpush.msrb.mxu0 %v513_v13 }
  0xc5   :  { %579 = vmatpush.msra.mxu3 %v496_v57  ;;  %559 = vmatpush.msra.mxu2 %v480_v4 }
  0xc6   :  { %619 = vmatpush.msrb.mxu1 %v528_v9  ;;  %599 = vmatpush.msrb.mxu0 %v512_v15 }
  0xc7   :  { %580 = vmatpush.msra.mxu3 %v495_v61  ;;  %560 = vmatpush.msra.mxu2 %v479_v7 }
  0xc8   :  { %620 = vmatpush.msrb.mxu1 %v527_v12  ;;  %600 = vmatpush.msrb.mxu0 %v511_v16 }
  0xc9   :  { %581 = vmatpush.msra.mxu3 %v494_v1  ;;  %561 = vmatpush.msra.mxu2 %v478_v10 }
  0xca   :  { %621 = vmatpush.msrb.mxu1 %v526_v14  ;;  %601 = vmatpush.msrb.mxu0 %v510_v17 }
 0x124   :  { %v371_v20 = vpop.f32.mrf.mxu0 }
 0x125   :  { %v391_v21 = vpop.f32.mrf.mxu1  ;;  %v372_v22 = vadd.f32 %v371_v20, %v307_v19 }
 0x127   :  { %v392_v24 = vadd.f32 %v391_v21, %v372_v22 }
 0x129   :  { %v475_v25 = vmax.f32 %v392_v24, 0.0 }
 0x12a   :  { %v331_v26 = vpop.f32.mrf.mxu2 }
 0x12b   :  { %v351_v27 = vpop.f32.mrf.mxu3  ;;  %v332_v29 = vadd.f32 %v331_v26, %v306_v23  ;;  %582 = vmatmul.f32.vlgmr.msra.gmra.mxu3 %v475_v25 }
 0x12c   :  { %v451_v31 = vpop.f32.mrf.mxu0 }
 0x12d   :  { %v352_v30 = vadd.f32 %v351_v27, %v332_v29  ;;  %v452_v32 = vadd.f32 %v451_v31, %v309_v28  ;;  %v471_v34 = vpop.f32.mrf.mxu1 }
 0x12f   :  { %v474_v33 = vmax.f32 %v352_v30, 0.0  ;;  %v472_v36 = vadd.f32 %v471_v34, %v452_v32 }
 0x131   :  { %562 = vmatmul.f32.vlgmr.msra.gmra.mxu2 %v474_v33  ;;  %v477_v37 = vmax.f32 %v472_v36, 0.0 }
 0x132   :  { %v411_v38 = vpop.f32.mrf.mxu2 }
 0x133   :  { %v412_v39 = vadd.f32 %v411_v38, %v308_v35  ;;  %v431_v40 = vpop.f32.mrf.mxu3  ;;  %622 = vmatmul.f32.vlgmr.msrb.gmra.mxu1 %v477_v37 }
 0x135   :  { %v432_v41 = vadd.f32 %v431_v40, %v412_v39 }
 0x137   :  { %v476_v42 = vmax.f32 %v432_v41, 0.0 }
 0x139   :  { %602 = vmatmul.f32.vlgmr.msrb.gmra.mxu0 %v476_v42 }
 0x1ae   :  { %v583_v46 = vpop.f32.mrf.mxu3 }
 0x1b0   :  { %v623_v50 = vpop.f32.mrf.mxu1 }
 0x1b4   :  { %v563_v44 = vpop.f32.mrf.mxu2 }
 0x1b5   :  { %v564_v45 = vadd.f32 %v662_v43, %v563_v44 }
 0x1b6   :  { %v603_v48 = vpop.f32.mrf.mxu0 }
 0x1b7   :  { %v584_v47 = vadd.f32 %v583_v46, %v564_v45 }
 0x1b9   :  { %v604_v49 = vadd.f32 %v603_v48, %v584_v47 }
 0x1bb   :  { %v624_v51 = vadd.f32 %v623_v50, %v604_v49 }
 0x1bd   :  { %626 = vst [vmem:[#allocation13] sm:$0xff] %v624_v51 }
 0x1be   :  { %637 = dma.vmem_to_hbm [thread:$0]  %s633_s11, 128, %s635_s14, [#allocation4]  }
 0x1bf   :  { %839 = dma.done.wait [#allocation4], 128  }
 0x1c0   :  { %840 = vsyncadd [#allocation4], 4294967168 }
 0x1c1   :  { %642 = vsyncpa [#allocation3], 1 }
 0x1c2   :  { %643 = vsyncpa [#allocation6], 1 }
 0x1c3   :  { %644 = vsyncpa [#allocation9], 1 }
 0x1c4   :  { %645 = vsyncpa [#allocation12], 1 }
 0x1c5   :  { %646 = vsyncpa [#allocation4], 1 }

</bundles_post_ra>
